<compile_context>
chip_gen: v6e
topology: v6e:2x2x1
jax: 0.10.0
libtpu: 0.0.40
codegen_flags: <defaults>
</compile_context>

<pallas_src>
import functools

import jax
import jax.numpy as jnp
from jax.experimental import pallas as pl
from jax.experimental.pallas import tpu as pltpu


def _round_up(x, m):
    return (x + m - 1) // m * m


def dqn_kernel(x_ref, w1_ref, b1_ref, w2_ref, b2_ref, out_ref):
    # Layer 1: x @ W1 (MXU, f32 accumulation) + b1, tanh (EUP) in f32.
    h = jnp.dot(x_ref[...], w1_ref[...], preferred_element_type=jnp.float32)
    h = jnp.tanh(h + b1_ref[...])            # b1 (1, hidden) broadcasts over the batch tile
    # Layer 2: h @ W2 + b2.
    h = h.astype(w2_ref.dtype)
    q = jnp.dot(h, w2_ref[...], preferred_element_type=jnp.float32)
    out_ref[...] = (q + b2_ref[...]).astype(out_ref.dtype)


@functools.partial(jax.jit, static_argnames=("block_batch",))
def dqn_forward(x, w1, b1, w2, b2, *, block_batch=8192):
    """Fused DQN MLP forward.

    x:  (B, n_input)   f32 or bf16 (output dtype follows x)
    w1: (n_input, 64)  b1: (1, 64)
    w2: (64, n_output) b2: (1, n_output)
    Returns (B, n_output) in x.dtype.
    """
    B, n_in = x.shape
    hidden, n_out = w2.shape

    mxu_dtype = x.dtype
    min_sub = 16 if mxu_dtype == jnp.bfloat16 else 8   # bf16 min tile is (16, 128)

    # --- batch tile selection ---------------------------------------------------------
    if B <= 2048:
        TB = _round_up(max(B, 1), min_sub)              # single tile, sublane-aligned
    else:
        # >= 4 grid steps (even count -> both v7x TensorCores stay busy + pipelined),
        # capped by block_batch so each x DMA is still a few hundred KiB at most.
        TB = min(block_batch, _round_up(-(-B // 4), min_sub))
    B_p = _round_up(B, TB)

    # Only the (cheap, small-feature) batch dim ever gets padded, and only when needed.
    x_in = x if B_p == B else jnp.pad(x, ((0, B_p - B), (0, 0)))

    # Weights are tiny: casting them to the MXU dtype is negligible. Biases stay f32
    # (added after the f32 accumulation; keeps the epilogue exact on v5e too).
    w1_c = w1.astype(mxu_dtype)
    w2_c = w2.astype(mxu_dtype)
    b1_c = b1.astype(jnp.float32)
    b2_c = b2.astype(jnp.float32)

    grid = (B_p // TB,)

    out = pl.pallas_call(
        dqn_kernel,
        out_shape=jax.ShapeDtypeStruct((B_p, n_out), x.dtype),
        grid_spec=pltpu.PrefetchScalarGridSpec(
            num_scalar_prefetch=0,
            grid=grid,
            in_specs=[
                pl.BlockSpec((TB, n_in), lambda i: (i, 0)),      # x: tiled over batch, unpadded features
                pl.BlockSpec((n_in, hidden), lambda i: (0, 0)),  # W1: VMEM-resident
                pl.BlockSpec((1, hidden), lambda i: (0, 0)),     # b1: VMEM-resident
                pl.BlockSpec((hidden, n_out), lambda i: (0, 0)), # W2: VMEM-resident
                pl.BlockSpec((1, n_out), lambda i: (0, 0)),      # b2: VMEM-resident
            ],
            out_specs=pl.BlockSpec((TB, n_out), lambda i: (i, 0)),
        ),
        compiler_params=pltpu.CompilerParams(
            # Batch tiles are independent -> shard grid across TensorCores (2 TCs on v7x).
            dimension_semantics=("parallel",),
        ),
    )(x_in, w1_c, b1_c, w2_c, b2_c)

    return out if B_p == B else out[:B]


def init_dqn_params(key, n_input, n_output, hidden=64):
    """Deterministic init mimicking PyTorch nn.Linear default (uniform +/- 1/sqrt(fan_in))."""
    k1, k2, k3, k4 = jax.random.split(key, 4)
    bound1 = 1.0 / jnp.sqrt(jnp.float32(n_input))
    bound2 = 1.0 / jnp.sqrt(jnp.float32(hidden))
    w1 = jax.random.uniform(k1, (n_input, hidden), jnp.float32, -bound1, bound1)
    b1 = jax.random.uniform(k2, (1, hidden), jnp.float32, -bound1, bound1)
    w2 = jax.random.uniform(k3, (hidden, n_output), jnp.float32, -bound2, bound2)
    b2 = jax.random.uniform(k4, (1, n_output), jnp.float32, -bound2, bound2)
    return w1, b1, w2, b2


def _ref_forward(x, w1, b1, w2, b2):
    return jnp.tanh(x @ w1 + b1) @ w2 + b2


if __name__ == "__main__":
    key = jax.random.PRNGKey(0)
    n_input, n_output = 8, 4
    k_x, k_p, k_xl = jax.random.split(key, 3)
    w1, b1, w2, b2 = init_dqn_params(k_p, n_input, n_output)

    # --- small batch (act()-style, single tile, batch padded to sublane width only) ---
    x_small = jax.random.normal(k_x, (2, n_input), jnp.float32)
    out_small = jax.block_until_ready(dqn_forward(x_small, w1, b1, w2, b2))
    ref_small = _ref_forward(x_small, w1, b1, w2, b2)
    assert out_small.shape == (2, n_output)
    assert jnp.allclose(out_small, ref_small, atol=1e-5, rtol=1e-5)

    # --- larger batch exercising the multi-tile (grid=4, pipelined, megacore) path ---
    x_large = jax.random.normal(k_xl, (4096, n_input), jnp.float32)
    out_large = jax.block_until_ready(dqn_forward(x_large, w1, b1, w2, b2))
    ref_large = _ref_forward(x_large, w1, b1, w2, b2)
    assert out_large.shape == (4096, n_output)
    assert jnp.allclose(out_large, ref_large, atol=1e-5, rtol=1e-5)

    # --- bf16-at-the-boundary path: x arrives (and Q-values leave) in bf16,
    #     f32 accumulation + f32 bias/tanh epilogue inside the kernel ---
    x_bf16 = x_large.astype(jnp.bfloat16)
    out_bf16 = jax.block_until_ready(dqn_forward(x_bf16, w1, b1, w2, b2))
    assert out_bf16.dtype == jnp.bfloat16
    assert jnp.allclose(out_bf16.astype(jnp.float32), ref_large, atol=5e-2, rtol=5e-2)

    print("KERNEL_OK")
</pallas_src>

<mosaic_0001>
module attributes {stable_mosaic.version = 11 : i64} {
  func.func @dqn_kernel(%arg0: i32, %arg1: memref<8x8xf32, #tpu.memory_space<vmem>>, %arg2: memref<8x64xf32, #tpu.memory_space<vmem>>, %arg3: memref<1x64xf32, #tpu.memory_space<vmem>>, %arg4: memref<64x4xf32, #tpu.memory_space<vmem>>, %arg5: memref<1x4xf32, #tpu.memory_space<vmem>>, %arg6: memref<8x4xf32, #tpu.memory_space<vmem>>) attributes {dimension_semantics = [#tpu.dimension_semantics<parallel>], iteration_bounds = array<i64: 1>, scalar_prefetch = 0 : i64, scratch_operands = 0 : i64, tpu.core_type = #tpu.core_type<tc>, window_params = [{transform_indices = @transform_0, window_bounds = array<i64: 8, 8>}, {pipeline_mode = #tpu.pipeline_mode<synchronous>, transform_indices = @transform_1, window_bounds = array<i64: 8, 64>}, {pipeline_mode = #tpu.pipeline_mode<synchronous>, transform_indices = @transform_2, window_bounds = array<i64: 1, 64>}, {pipeline_mode = #tpu.pipeline_mode<synchronous>, transform_indices = @transform_3, window_bounds = array<i64: 64, 4>}, {pipeline_mode = #tpu.pipeline_mode<synchronous>, transform_indices = @transform_4, window_bounds = array<i64: 1, 4>}, {transform_indices = @transform_5, window_bounds = array<i64: 8, 4>}]} {
    %c0 = arith.constant 0 : index
    %c0_0 = arith.constant 0 : index
    %0 = vector.load %arg1[%c0, %c0_0] : memref<8x8xf32, #tpu.memory_space<vmem>>, vector<8x8xf32>
    %c0_1 = arith.constant 0 : index
    %c0_2 = arith.constant 0 : index
    %1 = vector.load %arg2[%c0_1, %c0_2] : memref<8x64xf32, #tpu.memory_space<vmem>>, vector<8x64xf32>
    %cst = arith.constant dense<0.000000e+00> : vector<8x64xf32>
    %2 = tpu.matmul %0, %1, %cst {dimension_numbers = #tpu.dot_dimension_numbers<[1], [0], [0], [1], [0, 0, 1, 1], [], []>} : vector<8x8xf32>, vector<8x64xf32>, vector<8x64xf32> -> vector<8x64xf32>
    %c0_3 = arith.constant 0 : index
    %c0_4 = arith.constant 0 : index
    %3 = vector.load %arg3[%c0_3, %c0_4] : memref<1x64xf32, #tpu.memory_space<vmem>>, vector<1x64xf32>
    %4 = vector.broadcast %3 : vector<1x64xf32> to vector<8x64xf32>
    %5 = arith.addf %2, %4 : vector<8x64xf32>
    %6 = math.tanh %5 : vector<8x64xf32>
    %c0_5 = arith.constant 0 : index
    %c0_6 = arith.constant 0 : index
    %7 = vector.load %arg4[%c0_5, %c0_6] : memref<64x4xf32, #tpu.memory_space<vmem>>, vector<64x4xf32>
    %cst_7 = arith.constant dense<0.000000e+00> : vector<8x4xf32>
    %8 = tpu.matmul %6, %7, %cst_7 {dimension_numbers = #tpu.dot_dimension_numbers<[1], [0], [0], [1], [0, 0, 1, 1], [], []>} : vector<8x64xf32>, vector<64x4xf32>, vector<8x4xf32> -> vector<8x4xf32>
    %c0_8 = arith.constant 0 : index
    %c0_9 = arith.constant 0 : index
    %9 = vector.load %arg5[%c0_8, %c0_9] : memref<1x4xf32, #tpu.memory_space<vmem>>, vector<1x4xf32>
    %10 = vector.broadcast %9 : vector<1x4xf32> to vector<8x4xf32>
    %11 = arith.addf %8, %10 : vector<8x4xf32>
    %c0_10 = arith.constant 0 : index
    %c0_11 = arith.constant 0 : index
    %12 = vector.load %arg6[%c0_10, %c0_11] : memref<8x4xf32, #tpu.memory_space<vmem>>, vector<8x4xf32>
    tpu.vector_store %arg6[%c0_10, %c0_11], %11 {strides = array<i32>} : memref<8x4xf32, #tpu.memory_space<vmem>>, vector<8x4xf32>,
    return
  }
  func.func @transform_0(%arg0: i32) -> (i32, i32) {
    %c0_i32 = arith.constant 0 : i32
    %c0_i32_0 = arith.constant 0 : i32
    return %arg0, %c0_i32 : i32, i32
  }
  func.func @transform_1(%arg0: i32) -> (i32, i32) {
    %c0_i32 = arith.constant 0 : i32
    %c0_i32_0 = arith.constant 0 : i32
    %c0_i32_1 = arith.constant 0 : i32
    return %c0_i32, %c0_i32_0 : i32, i32
  }
  func.func @transform_2(%arg0: i32) -> (i32, i32) {
    %c0_i32 = arith.constant 0 : i32
    %c0_i32_0 = arith.constant 0 : i32
    %c0_i32_1 = arith.constant 0 : i32
    return %c0_i32, %c0_i32_0 : i32, i32
  }
  func.func @transform_3(%arg0: i32) -> (i32, i32) {
    %c0_i32 = arith.constant 0 : i32
    %c0_i32_0 = arith.constant 0 : i32
    %c0_i32_1 = arith.constant 0 : i32
    return %c0_i32, %c0_i32_0 : i32, i32
  }
  func.func @transform_4(%arg0: i32) -> (i32, i32) {
    %c0_i32 = arith.constant 0 : i32
    %c0_i32_0 = arith.constant 0 : i32
    %c0_i32_1 = arith.constant 0 : i32
    return %c0_i32, %c0_i32_0 : i32, i32
  }
  func.func @transform_5(%arg0: i32) -> (i32, i32) {
    %c0_i32 = arith.constant 0 : i32
    %c0_i32_0 = arith.constant 0 : i32
    return %arg0, %c0_i32 : i32, i32
  }
}

</mosaic_0001>

<bundles_post_ra>
// kernel: dqn_forward.1
= control target key start
LH: loop header
LB: loop body
LE: loop exit
PB: predicated region body
PF: predicated region fallthrough
CT: control target
= control target key end

     0   :  { %vm29_vm0 = vcmask 64512   ;;  %v242_v0 = vmov 0.0   ;;  %vm243_vm1 = vmmov 0   ;;  %vm119_vm2 = vcmask 523264   ;;  %s313_s1 = inlined_call_operand.vmem [shape: f32[8,64], index: 1, kind: input, shape index: {}]   ;;  %s314_s0 = inlined_call_operand.vmem [shape: f32[8,8], index: 0, kind: input, shape index: {}]   ;;  %s315_s3 = inlined_call_operand.vmem [shape: f32[64,4], index: 3, kind: input, shape index: {}]   ;;  %s316_s2 = inlined_call_operand.vmem [shape: f32[1,64], index: 2, kind: input, shape index: {}]   ;;  %s317_s4 = inlined_call_operand.vmem [shape: f32[1,4], index: 4, kind: input, shape index: {}]   ;;  %s318_s5 = inlined_call_operand.vmem [shape: f32[8,4], index: 5, kind: output, shape index: {}]  }
   0x1   :  { %214 = vmatprep.subr.mxu0 %v242_v0  ;;  %v21_v1 = vld [vmem:[%s313_s1] sm:$0xff]  ;;  %216 = vmatprep.mubr.msk.f32.mxu0 %vm243_vm1, %v242_v0  ;;  %v111_v3 = vld [vmem:[%s315_s3 + $0x38] sm:$0xff]  ;;  %v110_v4 = vld [vmem:[%s315_s3 + $0x30] sm:$0xff]  ;;  %vm193_vm3 = vcmask 31744  }
   0x2   :  { %v20_v2 = vld [vmem:[%s314_s0] sm:$0xff]  ;;  %215 = vmatpush3.msra.mxu0 %v21_v1  ;;  %219 = vmatprep.subr.mxu1 %v242_v0  ;;  %v109_v5 = vld [vmem:[%s315_s3 + $0x28] sm:$0xff]  ;;  %v107_v7 = vld [vmem:[%s315_s3 + $0x18] sm:$0xff] }
   0x3   :  { %217 = vmatmul.mubr.msk.f32.vlgmr.msra.gmra.mxu0 %vm29_vm0, %v20_v2  ;;  %235 = vmatprep.mubr.msk.f32.mxu1 %vm243_vm1, %v242_v0  ;;  %v108_v6 = vld [vmem:[%s315_s3 + $0x20] sm:$0xff]  ;;  %v106_v8 = vld [vmem:[%s315_s3 + $0x10] sm:$0xff]  ;;  %v105_v9 = vld [vmem:[%s315_s3 + $0x8] sm:$0xff] }
   0x4   :  { %220 = vmatpush3.msra.mxu1 %v111_v3  ;;  %v104_v10 = vld [vmem:[%s315_s3] sm:$0xff] }
   0x5   :  { %221 = vmatprep.subr.mxu1 %v242_v0  ;;  %v199_v11 = vld [vmem:[%s316_s2] ss:$0 sm:$0xff] }
   0x6   :  { %222 = vmatpush3.msra.mxu1 %v110_v4  ;;  %v201_v16 = vld [vmem:[%s317_s4] ss:$0 sm:$0xff] }
   0x7   :  { %223 = vmatprep.subr.mxu1 %v242_v0 }
   0x8   :  { %224 = vmatpush3.msra.mxu1 %v109_v5 }
   0x9   :  { %225 = vmatprep.subr.mxu1 %v242_v0 }
   0xa   :  { %226 = vmatpush3.msra.mxu1 %v108_v6 }
   0xb   :  { %227 = vmatprep.subr.mxu1 %v242_v0 }
   0xc   :  { %228 = vmatpush3.msra.mxu1 %v107_v7 }
   0xd   :  { %229 = vmatprep.subr.mxu1 %v242_v0 }
   0xe   :  { %230 = vmatpush3.msra.mxu1 %v106_v8 }
   0xf   :  { %231 = vmatprep.subr.mxu1 %v242_v0 }
  0x10   :  { %232 = vmatpush3.msra.mxu1 %v105_v9 }
  0x11   :  { %233 = vmatprep.subr.mxu1 %v242_v0 }
  0x12   :  { %234 = vmatpush3.msra.mxu1 %v104_v10 }
  0xc3   :  { %v99_v12 = vpop.f32.mrf.mxu0 }
  0xc4   :  { %v100_v13 = vadd.f32 %v199_v11, %v99_v12 }
  0xc5   :  { %v218_v14 = vpop.f32.mrf.mxu0 }
  0xc6   :  { %240 = vtanh.f32 %v100_v13 }
  0xd3   :  { %v241_v15 = vpop.eup %240 }
  0xd4   :  { %236 = vmatmul.mubr.msk.f32.vlgmr.msra.gmra.mxu1 %vm119_vm2, %v241_v15 }
 0x194   :  { %v189_v17 = vpop.f32.mrf.mxu1 }
 0x195   :  { %v190_v18 = vadd.f32 %v201_v16, %v189_v17 }
 0x196   :  { %v237_v19 = vpop.f32.mrf.mxu1 }
 0x197   :  { %194 = vst.msk [vmem:[%s318_s5] sm:$0xff] %vm193_vm3, %v190_v18 }

</bundles_post_ra>
